<compile_context>
chip_gen: v6e
topology: v6e:2x2x1
jax: 0.10.0
libtpu: 0.0.40
codegen_flags: <defaults>
</compile_context>

<pallas_src>
import functools

import jax
import jax.numpy as jnp
from jax.experimental import pallas as pl
from jax.experimental.pallas import tpu as pltpu

NEG_SLOPE = 0.2
LANE = 128
SUBLANE = 8


def _round_up(x, m):
    return ((x + m - 1) // m) * m


# ---------------------------------------------------------------------------
# Fused kernel: block-diagonal feature MLPs + rank head in one body (6 dots).
# ---------------------------------------------------------------------------
def _fused_kernel(x_ref, slope_ref,
                  fw1_ref, fb1_ref, fw2_ref, fb2_ref, fw3_ref, fb3_ref,
                  rw1_ref, rb1_ref, rw2_ref, rb2_ref, rw3_ref, rb3_ref,
                  o_ref):
    slope = slope_ref[...]   # (1, Dp): 0.2 on MLP lanes, 1.0 on pass-through/pad

    def bdot(a, w_ref):
        # bf16 x bf16 MXU matmul, f32 accumulate.
        return jnp.dot(a.astype(jnp.bfloat16), w_ref[...],
                       preferred_element_type=jnp.float32)

    def masked_leaky(h):
        # LeakyReLU(0.2) on MLP lanes; identity on whole_sim / padding lanes
        # (slope == 1.0 there, so where(h>0, h, h*1.0) == h).
        return jnp.where(h > 0, h, h * slope)

    def leaky(h):
        return jnp.where(h > 0, h, NEG_SLOPE * h)

    x = x_ref[...]                                    # (tile_b, Dp) f32

    # --- feature MLPs fused as block-diagonal (Dp, Dp) matmuls --------------
    h = masked_leaky(bdot(x, fw1_ref) + fb1_ref[...])
    h = masked_leaky(bdot(h, fw2_ref) + fb2_ref[...])
    t = bdot(h, fw3_ref) + fb3_ref[...]
    # t == concat([str2vec, whole_sim, cos2vec, euc2vec], axis=1), zero-padded.

    # --- learning2Rank head --------------------------------------------------
    h = leaky(bdot(t, rw1_ref) + rb1_ref[...])
    h = leaky(bdot(h, rw2_ref) + rb2_ref[...])
    logit = bdot(h, rw3_ref) + rb3_ref[...]           # (tile_b, 128), lane 0 real

    # Lane-dense writeback: transpose (XLU), keep row 0, sigmoid, store (1,tile_b).
    logit_t = jnp.transpose(logit, (1, 0))            # (128, tile_b)
    o_ref[...] = jax.nn.sigmoid(logit_t[0:1, :])      # (1, tile_b)


# ---------------------------------------------------------------------------
# Host-side one-time weight packing (block-diagonal, lane padding, bf16 cast).
# ---------------------------------------------------------------------------
def pack_fused_params(segments, rank_params, weight_dtype=jnp.bfloat16):
    """segments: list of (kind, n, params) in concat order; kind in {"mlp", "id"}.

    "mlp" params = (w1,b1,w2,b2,w3,b3) with w:(n,n), b:(1,n) (weights (in,out)).
    "id"  params = None (raw pass-through lanes, e.g. whole_sim).
    rank_params  = (w1,b1,w2,b2,w3,b3) with w1,w2:(D,D), w3:(D,1), b3:(1,1).
    """
    d = sum(n for _, n, _ in segments)
    d_pad = _round_up(d, LANE)

    fw = [jnp.zeros((d_pad, d_pad), jnp.float32) for _ in range(3)]
    fb = [jnp.zeros((1, d_pad), jnp.float32) for _ in range(3)]
    slope = jnp.ones((1, d_pad), jnp.float32)   # 1.0 = pass-through / pad lanes

    off = 0
    for kind, n, p in segments:
        sl = slice(off, off + n)
        if kind == "mlp":
            w1, b1, w2, b2, w3, b3 = p
            fw[0] = fw[0].at[sl, sl].set(w1); fb[0] = fb[0].at[:, sl].set(b1)
            fw[1] = fw[1].at[sl, sl].set(w2); fb[1] = fb[1].at[:, sl].set(b2)
            fw[2] = fw[2].at[sl, sl].set(w3); fb[2] = fb[2].at[:, sl].set(b3)
            slope = slope.at[:, sl].set(NEG_SLOPE)
        else:  # identity pass-through (whole_sim): eye blocks, zero bias, no act.
            eye = jnp.eye(n, dtype=jnp.float32)
            for k in range(3):
                fw[k] = fw[k].at[sl, sl].set(eye)
        off += n

    rw1, rb1, rw2, rb2, rw3, rb3 = rank_params
    D = rw1.shape[0]
    assert D == d, f"rank head built for mlp_dim={D}, but packed features give {d}"
    rw1p = jnp.zeros((d_pad, d_pad), jnp.float32).at[:D, :D].set(rw1)
    rb1p = jnp.zeros((1, d_pad), jnp.float32).at[:, :D].set(rb1)
    rw2p = jnp.zeros((d_pad, d_pad), jnp.float32).at[:D, :D].set(rw2)
    rb2p = jnp.zeros((1, d_pad), jnp.float32).at[:, :D].set(rb2)
    rw3p = jnp.zeros((d_pad, LANE), jnp.float32).at[:D, :1].set(rw3)
    rb3p = jnp.zeros((1, LANE), jnp.float32).at[:, :1].set(rb3)

    wd = weight_dtype
    return dict(
        d=d, d_pad=d_pad, slope=slope,
        fused=(fw[0].astype(wd), fb[0], fw[1].astype(wd), fb[1],
               fw[2].astype(wd), fb[2]),
        rank=(rw1p.astype(wd), rb1p, rw2p.astype(wd), rb2p,
              rw3p.astype(wd), rb3p),
    )


# ---------------------------------------------------------------------------
# Tiling / dispatch helpers.
# ---------------------------------------------------------------------------
@functools.lru_cache(maxsize=1)
def _is_multi_tc_chip():
    # v7x has 2 TensorCores per chip; split the batch grid so the "parallel"
    # axis can shard across both. Perf hint only -> swallow any probing errors.
    try:
        kind = jax.devices()[0].device_kind.lower()
    except Exception:
        return False
    return ("v7" in kind) or ("7x" in kind)


def _largest_dividing_tile(bpad, cap):
    t = max(LANE, (min(cap, bpad) // LANE) * LANE)
    while bpad % t:
        t -= LANE
    return t


def _choose_tiling(b, max_tile_b, want_split):
    bpad = _round_up(max(b, SUBLANE), SUBLANE)
    multi = (bpad > max_tile_b) or (want_split and bpad >= 2 * LANE)
    if not multi:
        # Single tile; block dims equal full array dims (always legal).
        return bpad, bpad
    # Multi-tile: tiles must be multiples of 128 rows so the transposed
    # (1, tile_b) output block stays unmasked lane-dense and divides bpad.
    bpad = _round_up(bpad, LANE)
    tile_b = _largest_dividing_tile(bpad, max_tile_b)
    if want_split and bpad // tile_b < 2:
        tile_b = _largest_dividing_tile(bpad, max(LANE, bpad // 2))
    return bpad, tile_b


def _full_spec(a):
    nd = a.ndim
    return pl.BlockSpec(a.shape, lambda i, _nd=nd: (0,) * _nd)


def _fused_call(packed, x, *, max_tile_b=1024):
    b, d = x.shape
    d_pad = packed["d_pad"]
    assert d == packed["d"]

    bpad, tile_b = _choose_tiling(b, max_tile_b, _is_multi_tc_chip())
    if (bpad != b) or (d_pad != d):
        # Single pad op (batch rows and, if some features are absent, lanes).
        x = jnp.pad(x, ((0, bpad - b), (0, d_pad - d)))

    inputs = (x, packed["slope"], *packed["fused"], *packed["rank"])
    in_specs = [pl.BlockSpec((tile_b, d_pad), lambda i: (i, 0))]
    in_specs += [_full_spec(a) for a in inputs[1:]]   # grid-invariant -> resident

    out = pl.pallas_call(
        _fused_kernel,
        out_shape=jax.ShapeDtypeStruct((1, bpad), jnp.float32),
        grid=(bpad // tile_b,),
        in_specs=in_specs,
        out_specs=pl.BlockSpec((1, tile_b), lambda i: (0, i)),
        compiler_params=pltpu.CompilerParams(dimension_semantics=("parallel",)),
    )(*inputs)
    return out[0, :b][:, None]


def learning2rank_raw_new_forward(packed, str_feature, whole_sim=None,
                                  cos_feature=None, euc_feature=None):
    """Mirrors learning2RankRawNew.forward (inference; dropout = identity).

    Features may be 1-D (single candidate, returns (1,1) like PyTorch) or 2-D
    (B, feat) batches (returns (B,1)).  The presence pattern of the optional
    features must match the one used to build `packed`.
    """
    feats = [f for f in (str_feature, whole_sim, cos_feature, euc_feature)
             if f is not None]
    feats = [jnp.atleast_2d(f).astype(jnp.float32) for f in feats]
    x = jnp.concatenate(feats, axis=1) if len(feats) > 1 else feats[0]
    return _fused_call(packed, x)


# ---------------------------------------------------------------------------
# Parameter init (PyTorch-Linear-style uniform), weights stored as (in, out).
# ---------------------------------------------------------------------------
def init_mlp3_params(key, dim):
    ks = jax.random.split(key, 6)
    scale = 1.0 / jnp.sqrt(dim)
    params = []
    for i in range(3):
        w = jax.random.uniform(ks[2 * i], (dim, dim), jnp.float32, -scale, scale)
        b = jax.random.uniform(ks[2 * i + 1], (1, dim), jnp.float32, -scale, scale)
        params += [w, b]
    return tuple(params)


def init_rank_params(key, mlp_dim):
    ks = jax.random.split(key, 6)
    scale = 1.0 / jnp.sqrt(mlp_dim)
    w1 = jax.random.uniform(ks[0], (mlp_dim, mlp_dim), jnp.float32, -scale, scale)
    b1 = jax.random.uniform(ks[1], (1, mlp_dim), jnp.float32, -scale, scale)
    w2 = jax.random.uniform(ks[2], (mlp_dim, mlp_dim), jnp.float32, -scale, scale)
    b2 = jax.random.uniform(ks[3], (1, mlp_dim), jnp.float32, -scale, scale)
    w3 = jax.random.uniform(ks[4], (mlp_dim, 1), jnp.float32, -scale, scale)
    b3 = jax.random.uniform(ks[5], (1, 1), jnp.float32, -scale, scale)
    return (w1, b1, w2, b2, w3, b3)


# ---------------------------------------------------------------------------
# Pure-JAX references (mirror the PyTorch forward) for verification.
#   compute_dtype=None        -> plain f32 reference (loose tolerance vs bf16 kernel)
#   compute_dtype=jnp.bfloat16 -> mirrors the kernel's bf16-weight / f32-accum path
# ---------------------------------------------------------------------------
def _reference_forward(raw, str_feature, whole_sim, cos_feature, euc_feature,
                       compute_dtype=None):
    def dot(a, w):
        if compute_dtype is None:
            return a @ w
        return jnp.dot(a.astype(compute_dtype), w.astype(compute_dtype),
                       preferred_element_type=jnp.float32)

    def mlp3(x, p):
        w1, b1, w2, b2, w3, b3 = p
        h = dot(x, w1) + b1
        h = jnp.where(h > 0, h, NEG_SLOPE * h)
        h = dot(h, w2) + b2
        h = jnp.where(h > 0, h, NEG_SLOPE * h)
        return dot(h, w3) + b3

    s = jnp.atleast_2d(str_feature).astype(jnp.float32)
    pieces = [mlp3(s, raw["str"])]
    if whole_sim is not None:
        pieces.append(jnp.atleast_2d(whole_sim).astype(jnp.float32))
    if cos_feature is not None:
        pieces.append(mlp3(jnp.atleast_2d(cos_feature).astype(jnp.float32), raw["cos"]))
    if euc_feature is not None:
        pieces.append(mlp3(jnp.atleast_2d(euc_feature).astype(jnp.float32), raw["euc"]))
    t = jnp.concatenate(pieces, axis=1)
    w1, b1, w2, b2, w3, b3 = raw["rank"]
    h = dot(t, w1) + b1
    h = jnp.where(h > 0, h, NEG_SLOPE * h)
    h = dot(h, w2) + b2
    h = jnp.where(h > 0, h, NEG_SLOPE * h)
    return jax.nn.sigmoid(dot(h, w3) + b3)


if __name__ == "__main__":
    key = jax.random.PRNGKey(0)
    k_str, k_cos, k_euc, k_rank, k_in = jax.random.split(key, 5)

    STR_BINS = 36
    COS_BINS = 41
    EUC_BINS = 41
    WHOLE_SIM_DIM = 10
    MLP_DIM = STR_BINS + WHOLE_SIM_DIM + COS_BINS + EUC_BINS  # 128
    B = 4  # small candidate batch

    raw_params = {
        "str": init_mlp3_params(k_str, STR_BINS),
        "cos": init_mlp3_params(k_cos, COS_BINS),
        "euc": init_mlp3_params(k_euc, EUC_BINS),
        "rank": init_rank_params(k_rank, MLP_DIM),
    }
    # One-time host-side packing: block-diagonal feature MLPs + padded rank head,
    # weights cast to bf16, biases kept in f32.
    packed = pack_fused_params(
        segments=[("mlp", STR_BINS, raw_params["str"]),
                  ("id", WHOLE_SIM_DIM, None),
                  ("mlp", COS_BINS, raw_params["cos"]),
                  ("mlp", EUC_BINS, raw_params["euc"])],
        rank_params=raw_params["rank"],
    )

    ki = jax.random.split(k_in, 4)
    str_feature = jax.random.normal(ki[0], (B, STR_BINS), jnp.float32)
    whole_sim = jax.random.normal(ki[1], (B, WHOLE_SIM_DIM), jnp.float32)
    cos_feature = jax.random.normal(ki[2], (B, COS_BINS), jnp.float32)
    euc_feature = jax.random.normal(ki[3], (B, EUC_BINS), jnp.float32)

    # --- batched call (fused, single pallas_call) ---------------------------
    out = learning2rank_raw_new_forward(packed, str_feature, whole_sim,
                                        cos_feature, euc_feature)
    out = jax.block_until_ready(out)
    ref32 = _reference_forward(raw_params, str_feature, whole_sim,
                               cos_feature, euc_feature)
    ref16 = _reference_forward(raw_params, str_feature, whole_sim,
                               cos_feature, euc_feature,
                               compute_dtype=jnp.bfloat16)
    assert out.shape == (B, 1)
    assert bool(jnp.all((out >= 0.0) & (out <= 1.0)))
    assert bool(jnp.allclose(out, ref32, rtol=3e-2, atol=3e-2)), \
        "batched mismatch vs f32 reference"
    assert bool(jnp.allclose(out, ref16, rtol=2e-3, atol=2e-3)), \
        "batched mismatch vs bf16 reference"

    # --- single-sample call (original PyTorch signature, (1,1) output) ------
    out1 = learning2rank_raw_new_forward(packed, str_feature[0], whole_sim[0],
                                         cos_feature[0], euc_feature[0])
    out1 = jax.block_until_ready(out1)
    ref1 = _reference_forward(raw_params, str_feature[0], whole_sim[0],
                              cos_feature[0], euc_feature[0])
    assert out1.shape == (1, 1)
    assert bool(jnp.allclose(out1, ref1, rtol=3e-2, atol=3e-2)), \
        "single-sample mismatch vs reference"

    # --- larger batch: exercises batch padding + lane-dense output tiling ---
    B2 = 133
    ki2 = jax.random.split(jax.random.PRNGKey(1), 4)
    sf2 = jax.random.normal(ki2[0], (B2, STR_BINS), jnp.float32)
    ws2 = jax.random.normal(ki2[1], (B2, WHOLE_SIM_DIM), jnp.float32)
    cf2 = jax.random.normal(ki2[2], (B2, COS_BINS), jnp.float32)
    ef2 = jax.random.normal(ki2[3], (B2, EUC_BINS), jnp.float32)
    out2 = learning2rank_raw_new_forward(packed, sf2, ws2, cf2, ef2)
    out2 = jax.block_until_ready(out2)
    ref2 = _reference_forward(raw_params, sf2, ws2, cf2, ef2)
    assert out2.shape == (B2, 1)
    assert bool(jnp.allclose(out2, ref2, rtol=3e-2, atol=3e-2)), \
        "large-batch mismatch vs reference"

    print("KERNEL_OK")
</pallas_src>

<mosaic_0001>
module attributes {stable_mosaic.version = 11 : i64} {
  func.func @_fused_kernel(%arg0: i32, %arg1: memref<8x128xf32, #tpu.memory_space<vmem>>, %arg2: memref<1x128xf32, #tpu.memory_space<vmem>>, %arg3: memref<128x128xbf16, #tpu.memory_space<vmem>>, %arg4: memref<1x128xf32, #tpu.memory_space<vmem>>, %arg5: memref<128x128xbf16, #tpu.memory_space<vmem>>, %arg6: memref<1x128xf32, #tpu.memory_space<vmem>>, %arg7: memref<128x128xbf16, #tpu.memory_space<vmem>>, %arg8: memref<1x128xf32, #tpu.memory_space<vmem>>, %arg9: memref<128x128xbf16, #tpu.memory_space<vmem>>, %arg10: memref<1x128xf32, #tpu.memory_space<vmem>>, %arg11: memref<128x128xbf16, #tpu.memory_space<vmem>>, %arg12: memref<1x128xf32, #tpu.memory_space<vmem>>, %arg13: memref<128x128xbf16, #tpu.memory_space<vmem>>, %arg14: memref<1x128xf32, #tpu.memory_space<vmem>>, %arg15: memref<1x8xf32, #tpu.memory_space<vmem>>) attributes {dimension_semantics = [#tpu.dimension_semantics<parallel>], iteration_bounds = array<i64: 1>, scalar_prefetch = 0 : i64, scratch_operands = 0 : i64, tpu.core_type = #tpu.core_type<tc>, window_params = [{transform_indices = @transform_0, window_bounds = array<i64: 8, 128>}, {pipeline_mode = #tpu.pipeline_mode<synchronous>, transform_indices = @transform_1, window_bounds = array<i64: 1, 128>}, {pipeline_mode = #tpu.pipeline_mode<synchronous>, transform_indices = @transform_2, window_bounds = array<i64: 128, 128>}, {pipeline_mode = #tpu.pipeline_mode<synchronous>, transform_indices = @transform_3, window_bounds = array<i64: 1, 128>}, {pipeline_mode = #tpu.pipeline_mode<synchronous>, transform_indices = @transform_4, window_bounds = array<i64: 128, 128>}, {pipeline_mode = #tpu.pipeline_mode<synchronous>, transform_indices = @transform_5, window_bounds = array<i64: 1, 128>}, {pipeline_mode = #tpu.pipeline_mode<synchronous>, transform_indices = @transform_6, window_bounds = array<i64: 128, 128>}, {pipeline_mode = #tpu.pipeline_mode<synchronous>, transform_indices = @transform_7, window_bounds = array<i64: 1, 128>}, {pipeline_mode = #tpu.pipeline_mode<synchronous>, transform_indices = @transform_8, window_bounds = array<i64: 128, 128>}, {pipeline_mode = #tpu.pipeline_mode<synchronous>, transform_indices = @transform_9, window_bounds = array<i64: 1, 128>}, {pipeline_mode = #tpu.pipeline_mode<synchronous>, transform_indices = @transform_10, window_bounds = array<i64: 128, 128>}, {pipeline_mode = #tpu.pipeline_mode<synchronous>, transform_indices = @transform_11, window_bounds = array<i64: 1, 128>}, {pipeline_mode = #tpu.pipeline_mode<synchronous>, transform_indices = @transform_12, window_bounds = array<i64: 128, 128>}, {pipeline_mode = #tpu.pipeline_mode<synchronous>, transform_indices = @transform_13, window_bounds = array<i64: 1, 128>}, {transform_indices = @transform_14, window_bounds = array<i64: 1, 8>}]} {
    %c0 = arith.constant 0 : index
    %c0_0 = arith.constant 0 : index
    %0 = vector.load %arg2[%c0, %c0_0] : memref<1x128xf32, #tpu.memory_space<vmem>>, vector<1x128xf32>
    %c0_1 = arith.constant 0 : index
    %c0_2 = arith.constant 0 : index
    %1 = vector.load %arg1[%c0_1, %c0_2] : memref<8x128xf32, #tpu.memory_space<vmem>>, vector<8x128xf32>
    %2 = arith.truncf %1 : vector<8x128xf32> to vector<8x128xbf16>
    %c0_3 = arith.constant 0 : index
    %c0_4 = arith.constant 0 : index
    %3 = vector.load %arg3[%c0_3, %c0_4] : memref<128x128xbf16, #tpu.memory_space<vmem>>, vector<128x128xbf16>
    %cst = arith.constant dense<0.000000e+00> : vector<8x128xf32>
    %4 = tpu.matmul %2, %3, %cst {dimension_numbers = #tpu.dot_dimension_numbers<[1], [0], [0], [1], [0, 0, 1, 1], [], []>} : vector<8x128xbf16>, vector<128x128xbf16>, vector<8x128xf32> -> vector<8x128xf32>
    %c0_5 = arith.constant 0 : index
    %c0_6 = arith.constant 0 : index
    %5 = vector.load %arg4[%c0_5, %c0_6] : memref<1x128xf32, #tpu.memory_space<vmem>>, vector<1x128xf32>
    %6 = vector.broadcast %5 : vector<1x128xf32> to vector<8x128xf32>
    %7 = arith.addf %4, %6 : vector<8x128xf32>
    %cst_7 = arith.constant 0.000000e+00 : f32
    %8 = vector.broadcast %cst_7 : f32 to vector<8x128xf32>
    %9 = arith.cmpf ogt, %7, %8 : vector<8x128xf32>
    %10 = vector.broadcast %0 : vector<1x128xf32> to vector<8x128xf32>
    %11 = arith.mulf %7, %10 : vector<8x128xf32>
    %12 = arith.select %9, %7, %11 : vector<8x128xi1>, vector<8x128xf32>
    %13 = arith.truncf %12 : vector<8x128xf32> to vector<8x128xbf16>
    %c0_8 = arith.constant 0 : index
    %c0_9 = arith.constant 0 : index
    %14 = vector.load %arg5[%c0_8, %c0_9] : memref<128x128xbf16, #tpu.memory_space<vmem>>, vector<128x128xbf16>
    %cst_10 = arith.constant dense<0.000000e+00> : vector<8x128xf32>
    %15 = tpu.matmul %13, %14, %cst_10 {dimension_numbers = #tpu.dot_dimension_numbers<[1], [0], [0], [1], [0, 0, 1, 1], [], []>} : vector<8x128xbf16>, vector<128x128xbf16>, vector<8x128xf32> -> vector<8x128xf32>
    %c0_11 = arith.constant 0 : index
    %c0_12 = arith.constant 0 : index
    %16 = vector.load %arg6[%c0_11, %c0_12] : memref<1x128xf32, #tpu.memory_space<vmem>>, vector<1x128xf32>
    %17 = vector.broadcast %16 : vector<1x128xf32> to vector<8x128xf32>
    %18 = arith.addf %15, %17 : vector<8x128xf32>
    %cst_13 = arith.constant 0.000000e+00 : f32
    %19 = vector.broadcast %cst_13 : f32 to vector<8x128xf32>
    %20 = arith.cmpf ogt, %18, %19 : vector<8x128xf32>
    %21 = vector.broadcast %0 : vector<1x128xf32> to vector<8x128xf32>
    %22 = arith.mulf %18, %21 : vector<8x128xf32>
    %23 = arith.select %20, %18, %22 : vector<8x128xi1>, vector<8x128xf32>
    %24 = arith.truncf %23 : vector<8x128xf32> to vector<8x128xbf16>
    %c0_14 = arith.constant 0 : index
    %c0_15 = arith.constant 0 : index
    %25 = vector.load %arg7[%c0_14, %c0_15] : memref<128x128xbf16, #tpu.memory_space<vmem>>, vector<128x128xbf16>
    %cst_16 = arith.constant dense<0.000000e+00> : vector<8x128xf32>
    %26 = tpu.matmul %24, %25, %cst_16 {dimension_numbers = #tpu.dot_dimension_numbers<[1], [0], [0], [1], [0, 0, 1, 1], [], []>} : vector<8x128xbf16>, vector<128x128xbf16>, vector<8x128xf32> -> vector<8x128xf32>
    %c0_17 = arith.constant 0 : index
    %c0_18 = arith.constant 0 : index
    %27 = vector.load %arg8[%c0_17, %c0_18] : memref<1x128xf32, #tpu.memory_space<vmem>>, vector<1x128xf32>
    %28 = vector.broadcast %27 : vector<1x128xf32> to vector<8x128xf32>
    %29 = arith.addf %26, %28 : vector<8x128xf32>
    %30 = arith.truncf %29 : vector<8x128xf32> to vector<8x128xbf16>
    %c0_19 = arith.constant 0 : index
    %c0_20 = arith.constant 0 : index
    %31 = vector.load %arg9[%c0_19, %c0_20] : memref<128x128xbf16, #tpu.memory_space<vmem>>, vector<128x128xbf16>
    %cst_21 = arith.constant dense<0.000000e+00> : vector<8x128xf32>
    %32 = tpu.matmul %30, %31, %cst_21 {dimension_numbers = #tpu.dot_dimension_numbers<[1], [0], [0], [1], [0, 0, 1, 1], [], []>} : vector<8x128xbf16>, vector<128x128xbf16>, vector<8x128xf32> -> vector<8x128xf32>
    %c0_22 = arith.constant 0 : index
    %c0_23 = arith.constant 0 : index
    %33 = vector.load %arg10[%c0_22, %c0_23] : memref<1x128xf32, #tpu.memory_space<vmem>>, vector<1x128xf32>
    %34 = vector.broadcast %33 : vector<1x128xf32> to vector<8x128xf32>
    %35 = arith.addf %32, %34 : vector<8x128xf32>
    %cst_24 = arith.constant 0.000000e+00 : f32
    %36 = vector.broadcast %cst_24 : f32 to vector<8x128xf32>
    %37 = arith.cmpf ogt, %35, %36 : vector<8x128xf32>
    %cst_25 = arith.constant 2.000000e-01 : f32
    %38 = vector.broadcast %cst_25 : f32 to vector<8x128xf32>
    %39 = arith.mulf %38, %35 : vector<8x128xf32>
    %40 = arith.select %37, %35, %39 : vector<8x128xi1>, vector<8x128xf32>
    %41 = arith.truncf %40 : vector<8x128xf32> to vector<8x128xbf16>
    %c0_26 = arith.constant 0 : index
    %c0_27 = arith.constant 0 : index
    %42 = vector.load %arg11[%c0_26, %c0_27] : memref<128x128xbf16, #tpu.memory_space<vmem>>, vector<128x128xbf16>
    %cst_28 = arith.constant dense<0.000000e+00> : vector<8x128xf32>
    %43 = tpu.matmul %41, %42, %cst_28 {dimension_numbers = #tpu.dot_dimension_numbers<[1], [0], [0], [1], [0, 0, 1, 1], [], []>} : vector<8x128xbf16>, vector<128x128xbf16>, vector<8x128xf32> -> vector<8x128xf32>
    %c0_29 = arith.constant 0 : index
    %c0_30 = arith.constant 0 : index
    %44 = vector.load %arg12[%c0_29, %c0_30] : memref<1x128xf32, #tpu.memory_space<vmem>>, vector<1x128xf32>
    %45 = vector.broadcast %44 : vector<1x128xf32> to vector<8x128xf32>
    %46 = arith.addf %43, %45 : vector<8x128xf32>
    %cst_31 = arith.constant 0.000000e+00 : f32
    %47 = vector.broadcast %cst_31 : f32 to vector<8x128xf32>
    %48 = arith.cmpf ogt, %46, %47 : vector<8x128xf32>
    %cst_32 = arith.constant 2.000000e-01 : f32
    %49 = vector.broadcast %cst_32 : f32 to vector<8x128xf32>
    %50 = arith.mulf %49, %46 : vector<8x128xf32>
    %51 = arith.select %48, %46, %50 : vector<8x128xi1>, vector<8x128xf32>
    %52 = arith.truncf %51 : vector<8x128xf32> to vector<8x128xbf16>
    %c0_33 = arith.constant 0 : index
    %c0_34 = arith.constant 0 : index
    %53 = vector.load %arg13[%c0_33, %c0_34] : memref<128x128xbf16, #tpu.memory_space<vmem>>, vector<128x128xbf16>
    %cst_35 = arith.constant dense<0.000000e+00> : vector<8x128xf32>
    %54 = tpu.matmul %52, %53, %cst_35 {dimension_numbers = #tpu.dot_dimension_numbers<[1], [0], [0], [1], [0, 0, 1, 1], [], []>} : vector<8x128xbf16>, vector<128x128xbf16>, vector<8x128xf32> -> vector<8x128xf32>
    %c0_36 = arith.constant 0 : index
    %c0_37 = arith.constant 0 : index
    %55 = vector.load %arg14[%c0_36, %c0_37] : memref<1x128xf32, #tpu.memory_space<vmem>>, vector<1x128xf32>
    %56 = vector.broadcast %55 : vector<1x128xf32> to vector<8x128xf32>
    %57 = arith.addf %54, %56 : vector<8x128xf32>
    %58 = tpu.transpose %57, [1, 0] : vector<8x128xf32> -> vector<128x8xf32>
    %59 = vector.extract_strided_slice %58 {offsets = [0, 0], sizes = [1, 8], strides = [1, 1]} : vector<128x8xf32> to vector<1x8xf32>
    %60 = arith.negf %59 : vector<1x8xf32>
    %61 = math.exp %60 : vector<1x8xf32>
    %cst_38 = arith.constant 1.000000e+00 : f32
    %62 = vector.broadcast %cst_38 : f32 to vector<1x8xf32>
    %63 = arith.addf %62, %61 : vector<1x8xf32>
    %64 = arith.divf %62, %63 : vector<1x8xf32>
    %c0_39 = arith.constant 0 : index
    %c0_40 = arith.constant 0 : index
    %65 = vector.load %arg15[%c0_39, %c0_40] : memref<1x8xf32, #tpu.memory_space<vmem>>, vector<1x8xf32>
    tpu.vector_store %arg15[%c0_39, %c0_40], %64 {strides = array<i32>} : memref<1x8xf32, #tpu.memory_space<vmem>>, vector<1x8xf32>,
    return
  }
  func.func @transform_0(%arg0: i32) -> (i32, i32) {
    %c0_i32 = arith.constant 0 : i32
    %c0_i32_0 = arith.constant 0 : i32
    return %arg0, %c0_i32 : i32, i32
  }
  func.func @transform_1(%arg0: i32) -> (i32, i32) {
    %c0_i32 = arith.constant 0 : i32
    %c0_i32_0 = arith.constant 0 : i32
    %c0_i32_1 = arith.constant 0 : i32
    return %c0_i32, %c0_i32_0 : i32, i32
  }
  func.func @transform_2(%arg0: i32) -> (i32, i32) {
    %c0_i32 = arith.constant 0 : i32
    %c0_i32_0 = arith.constant 0 : i32
    %c0_i32_1 = arith.constant 0 : i32
    return %c0_i32, %c0_i32_0 : i32, i32
  }
  func.func @transform_3(%arg0: i32) -> (i32, i32) {
    %c0_i32 = arith.constant 0 : i32
    %c0_i32_0 = arith.constant 0 : i32
    %c0_i32_1 = arith.constant 0 : i32
    return %c0_i32, %c0_i32_0 : i32, i32
  }
  func.func @transform_4(%arg0: i32) -> (i32, i32) {
    %c0_i32 = arith.constant 0 : i32
    %c0_i32_0 = arith.constant 0 : i32
    %c0_i32_1 = arith.constant 0 : i32
    return %c0_i32, %c0_i32_0 : i32, i32
  }
  func.func @transform_5(%arg0: i32) -> (i32, i32) {
    %c0_i32 = arith.constant 0 : i32
    %c0_i32_0 = arith.constant 0 : i32
    %c0_i32_1 = arith.constant 0 : i32
    return %c0_i32, %c0_i32_0 : i32, i32
  }
  func.func @transform_6(%arg0: i32) -> (i32, i32) {
    %c0_i32 = arith.constant 0 : i32
    %c0_i32_0 = arith.constant 0 : i32
    %c0_i32_1 = arith.constant 0 : i32
    return %c0_i32, %c0_i32_0 : i32, i32
  }
  func.func @transform_7(%arg0: i32) -> (i32, i32) {
    %c0_i32 = arith.constant 0 : i32
    %c0_i32_0 = arith.constant 0 : i32
    %c0_i32_1 = arith.constant 0 : i32
    return %c0_i32, %c0_i32_0 : i32, i32
  }
  func.func @transform_8(%arg0: i32) -> (i32, i32) {
    %c0_i32 = arith.constant 0 : i32
    %c0_i32_0 = arith.constant 0 : i32
    %c0_i32_1 = arith.constant 0 : i32
    return %c0_i32, %c0_i32_0 : i32, i32
  }
  func.func @transform_9(%arg0: i32) -> (i32, i32) {
    %c0_i32 = arith.constant 0 : i32
    %c0_i32_0 = arith.constant 0 : i32
    %c0_i32_1 = arith.constant 0 : i32
    return %c0_i32, %c0_i32_0 : i32, i32
  }
  func.func @transform_10(%arg0: i32) -> (i32, i32) {
    %c0_i32 = arith.constant 0 : i32
    %c0_i32_0 = arith.constant 0 : i32
    %c0_i32_1 = arith.constant 0 : i32
    return %c0_i32, %c0_i32_0 : i32, i32
  }
  func.func @transform_11(%arg0: i32) -> (i32, i32) {
    %c0_i32 = arith.constant 0 : i32
    %c0_i32_0 = arith.constant 0 : i32
    %c0_i32_1 = arith.constant 0 : i32
    return %c0_i32, %c0_i32_0 : i32, i32
  }
  func.func @transform_12(%arg0: i32) -> (i32, i32) {
    %c0_i32 = arith.constant 0 : i32
    %c0_i32_0 = arith.constant 0 : i32
    %c0_i32_1 = arith.constant 0 : i32
    return %c0_i32, %c0_i32_0 : i32, i32
  }
  func.func @transform_13(%arg0: i32) -> (i32, i32) {
    %c0_i32 = arith.constant 0 : i32
    %c0_i32_0 = arith.constant 0 : i32
    %c0_i32_1 = arith.constant 0 : i32
    return %c0_i32, %c0_i32_0 : i32, i32
  }
  func.func @transform_14(%arg0: i32) -> (i32, i32) {
    %c0_i32 = arith.constant 0 : i32
    %c0_i32_0 = arith.constant 0 : i32
    return %c0_i32, %arg0 : i32, i32
  }
}

</mosaic_0001>

<bundles_post_ra>
// kernel: tpu_custom_call.1
= control target key start
LH: loop header
LB: loop body
LE: loop exit
PB: predicated region body
PF: predicated region fallthrough
CT: control target
= control target key end

     0   :  { %19 = vsyncpa [#allocation3], 0  ;;  %s1566_s0 = inlined_call_operand.hbm [shape: f32[8,128], index: 0, kind: input, shape index: {}]   ;;  %s1567_s1 = inlined_call_operand.vmem [shape: f32[1,128], index: 1, kind: input, shape index: {}]   ;;  %s1568_s2 = inlined_call_operand.hbm [shape: bf16[128,128], index: 2, kind: input, shape index: {}]   ;;  %s1569_s3 = inlined_call_operand.vmem [shape: f32[1,128], index: 3, kind: input, shape index: {}]   ;;  %s1570_s4 = inlined_call_operand.hbm [shape: bf16[128,128], index: 4, kind: input, shape index: {}]   ;;  %s1571_s5 = inlined_call_operand.vmem [shape: f32[1,128], index: 5, kind: input, shape index: {}]   ;;  %s1572_s6 = inlined_call_operand.hbm [shape: bf16[128,128], index: 6, kind: input, shape index: {}]   ;;  %s1573_s7 = inlined_call_operand.vmem [shape: f32[1,128], index: 7, kind: input, shape index: {}]   ;;  %s1574_s8 = inlined_call_operand.hbm [shape: bf16[128,128], index: 8, kind: input, shape index: {}]   ;;  %s1575_s9 = inlined_call_operand.vmem [shape: f32[1,128], index: 9, kind: input, shape index: {}]   ;;  %s1576_s10 = inlined_call_operand.hbm [shape: bf16[128,128], index: 10, kind: input, shape index: {}]   ;;  %s1577_s11 = inlined_call_operand.vmem [shape: f32[1,128], index: 11, kind: input, shape index: {}]   ;;  %s1578_s12 = inlined_call_operand.hbm [shape: bf16[128,128], index: 12, kind: input, shape index: {}]   ;;  %s1579_s13 = inlined_call_operand.vmem [shape: f32[1,128], index: 13, kind: input, shape index: {}]   ;;  %s1580_s14 = inlined_call_operand.hbm [shape: f32[1,8], index: 14, kind: output, shape index: {}]  }
   0x1   :  { %20 = vsyncpa [#allocation6], 0 }
   0x2   :  { %21 = vsyncpa [#allocation9], 0 }
   0x3   :  { %22 = vsyncpa [#allocation12], 0 }
   0x4   :  { %23 = vsyncpa [#allocation4], 0  ;;  %s1356_s29 = smov [#allocation5]  }
   0x5   :  { %s41_s30 = sshll.u32 %s1356_s29, 4  ;;  %s42_s30 = int_to_ptr.vmem [resolvable:$true] %s41_s30 }
   0x6   :  { %s1194_s15 = scalar_lea.vmem %s42_s30, 1024  ;;  %p1199_p1 = scmp.lt.s32.totalorder %s42_s30, %s42_s30 }
   0x7   :  { %p1195_p0 = scmp.ne.s32.totalorder %s42_s30, %s1194_s15  ;;  %p1200_p2 = scmp.lt.s32.totalorder %s1194_s15, %s1194_s15 }
   0x9   :  { %p1201_p3 = por %p1200_p2, %p1199_p1 }
   0xb   :  { %p1202_p4 = pnand %p1201_p3, %p1195_p0 }
   0xd   :  { %1205 = shalt.err (!%p1202_p4)
}
   0xe   :  { %s1357_s16 = smov 64   ;;  %s1358_s17 = smov 4  }
   0xf   :  { %47 = dma.hbm_to_vmem [thread:$0]  %s1568_s2, 1024, %s42_s30, [#allocation6], %s1357_s16, %s1357_s16, %s1358_s17  }
  0x10   :  { %s1359_s20 = smov [#allocation8]   ;;  %s1360_s22 = smov [#allocation11]  }
  0x11   :  { %s69_s21 = sshll.u32 %s1359_s20, 4  ;;  %s97_s23 = sshll.u32 %s1360_s22, 4  ;;  %s70_s21 = int_to_ptr.vmem [resolvable:$true] %s69_s21  ;;  %s98_s23 = int_to_ptr.vmem [resolvable:$true] %s97_s23 }
  0x12   :  { %s1214_s24 = scalar_lea.vmem %s70_s21, 1024  ;;  %p1219_p6 = scmp.lt.s32.totalorder %s70_s21, %s70_s21 }
  0x13   :  { %p1215_p5 = scmp.ne.s32.totalorder %s70_s21, %s1214_s24  ;;  %p1220_p7 = scmp.lt.s32.totalorder %s1214_s24, %s1214_s24 }
  0x15   :  { %p1221_p8 = por %p1220_p7, %p1219_p6 }
  0x17   :  { %p1222_p9 = pnand %p1221_p8, %p1215_p5 }
  0x19   :  { %1225 = shalt.err (!%p1222_p9)
}
  0x1a   :  { %75 = dma.hbm_to_vmem [thread:$0]  %s1572_s6, 1024, %s70_s21, [#allocation9], %s1357_s16, %s1357_s16, %s1358_s17  }
  0x1b   :  { %s1234_s2 = scalar_lea.vmem %s98_s23, 1024  ;;  %p1239_p11 = scmp.lt.s32.totalorder %s98_s23, %s98_s23 }
  0x1c   :  { %p1235_p10 = scmp.ne.s32.totalorder %s98_s23, %s1234_s2  ;;  %p1240_p12 = scmp.lt.s32.totalorder %s1234_s2, %s1234_s2 }
  0x1e   :  { %p1241_p13 = por %p1240_p12, %p1239_p11 }
  0x20   :  { %p1242_p0 = pnand %p1241_p13, %p1235_p10 }
  0x22   :  { %1245 = shalt.err (!%p1242_p0)
}
  0x23   :  { %103 = dma.hbm_to_vmem [thread:$0]  %s1576_s10, 1024, %s98_s23, [#allocation12], %s1357_s16, %s1357_s16, %s1358_s17  }
  0x24   :  { %s1361_s29 = smov [#allocation2]   ;;  %s1362_s15 = smov [#allocation7]  }
  0x25   :  { %s30_s30 = sshll.u32 %s1361_s29, 4  ;;  %s55_s6 = sshll.u32 %s1362_s15, 4  ;;  %s31_s30 = int_to_ptr.vmem [resolvable:$true] %s30_s30  ;;  %s56_s6 = int_to_ptr.vmem [resolvable:$true] %s55_s6 }
  0x26   :  { %s1254_s18 = scalar_lea.vmem %s31_s30, 128  ;;  %p1259_p2 = scmp.lt.s32.totalorder %s31_s30, %s31_s30 }
  0x27   :  { %p1255_p1 = scmp.ne.s32.totalorder %s31_s30, %s1254_s18  ;;  %p1260_p3 = scmp.lt.s32.totalorder %s1254_s18, %s1254_s18 }
  0x29   :  { %p1261_p4 = por %p1260_p3, %p1259_p2 }
  0x2b   :  { %p1262_p5 = pnand %p1261_p4, %p1255_p1 }
  0x2d   :  { %1265 = shalt.err (!%p1262_p5)
}
  0x2e   :  { %33 = dma.hbm_to_vmem [thread:$0]  %s1566_s0, 128, %s31_s30, [#allocation3]  }
  0x2f   :  { %s1274_s21 = scalar_lea.vmem %s56_s6, 1024  ;;  %p1279_p7 = scmp.lt.s32.totalorder %s56_s6, %s56_s6 }
  0x30   :  { %p1275_p6 = scmp.ne.s32.totalorder %s56_s6, %s1274_s21  ;;  %p1280_p8 = scmp.lt.s32.totalorder %s1274_s21, %s1274_s21 }
  0x32   :  { %p1281_p9 = por %p1280_p8, %p1279_p7 }
  0x34   :  { %p1282_p10 = pnand %p1281_p9, %p1275_p6 }
  0x36   :  { %1285 = shalt.err (!%p1282_p10)
}
  0x37   :  { %61 = dma.hbm_to_vmem [thread:$0]  %s1570_s4, 1024, %s56_s6, [#allocation6], %s1357_s16, %s1357_s16, %s1358_s17  }
  0x38   :  { %s1363_s23 = smov [#allocation10]   ;;  %s1364_s25 = smov [#allocation13]  }
  0x39   :  { %s83_s24 = sshll.u32 %s1363_s23, 4  ;;  %s111_s0 = sshll.u32 %s1364_s25, 4  ;;  %s84_s24 = int_to_ptr.vmem [resolvable:$true] %s83_s24  ;;  %s112_s0 = int_to_ptr.vmem [resolvable:$true] %s111_s0 }
  0x3a   :  { %s1294_s26 = scalar_lea.vmem %s84_s24, 1024  ;;  %p1299_p12 = scmp.lt.s32.totalorder %s84_s24, %s84_s24 }
  0x3b   :  { %p1295_p11 = scmp.ne.s32.totalorder %s84_s24, %s1294_s26  ;;  %p1300_p13 = scmp.lt.s32.totalorder %s1294_s26, %s1294_s26 }
  0x3d   :  { %p1301_p0 = por %p1300_p13, %p1299_p12 }
  0x3f   :  { %p1302_p1 = pnand %p1301_p0, %p1295_p11 }
  0x41   :  { %1305 = shalt.err (!%p1302_p1)
}
  0x42   :  { %89 = dma.hbm_to_vmem [thread:$0]  %s1574_s8, 1024, %s84_s24, [#allocation9], %s1357_s16, %s1357_s16, %s1358_s17  }
  0x43   :  { %s1314_s4 = scalar_lea.vmem %s112_s0, 1024  ;;  %p1319_p3 = scmp.lt.s32.totalorder %s112_s0, %s112_s0 }
  0x44   :  { %p1315_p2 = scmp.ne.s32.totalorder %s112_s0, %s1314_s4  ;;  %p1320_p4 = scmp.lt.s32.totalorder %s1314_s4, %s1314_s4 }
  0x46   :  { %p1321_p5 = por %p1320_p4, %p1319_p3 }
  0x48   :  { %p1322_p6 = pnand %p1321_p5, %p1315_p2 }
  0x4a   :  { %1325 = shalt.err (!%p1322_p6)
}
  0x4b   :  { %117 = dma.hbm_to_vmem [thread:$0]  %s1578_s12, 1024, %s112_s0, [#allocation12], %s1357_s16, %s1357_s16, %s1358_s17  }
  0x4c   :  { %1346 = dma.done.wait [#allocation3], 128  }
  0x4d   :  { %1347 = vsyncadd [#allocation3], 4294967168 }
  0x4e   :  { %1348 = dma.done.wait [#allocation6], 2048  }
  0x4f   :  { %1349 = vsyncadd [#allocation6], 4294965248 }
  0x50   :  { %1350 = dma.done.wait [#allocation9], 2048  }
  0x51   :  { %1351 = vsyncadd [#allocation9], 4294965248 }
  0x52   :  { %1352 = dma.done.wait [#allocation12], 2048  }
  0x53   :  { %1353 = vsyncadd [#allocation12], 4294965248  ;;  %v1365_v0 = vmov 0.0   ;;  %vm1366_vm0 = vmmov 0   ;;  %v1134_v1 = vld [vmem:[#allocation5 + $0x38] sm:$0xff]   ;;  %v1135_v2 = vld [vmem:[#allocation5 + $0x30] sm:$0xff]  }
  0x54   :  { %1002 = vmatprep.subr.bf16.mxu0 %v1365_v0  ;;  %1018 = vmatprep.mubr.msk.bf16.mxu0 %vm1366_vm0, %v1365_v0  ;;  %v1136_v3 = vld [vmem:[#allocation5 + $0x28] sm:$0xff]   ;;  %v1142_v4 = vld [vmem:[#allocation7 + $0x38] sm:$0xff]   ;;  %v1137_v5 = vld [vmem:[#allocation5 + $0x20] sm:$0xff]   ;;  %vm872_vm5 = vcmask 57344  }
  0x55   :  { %1022 = vmatprep.subr.bf16.mxu1 %v1365_v0  ;;  %1038 = vmatprep.mubr.msk.bf16.mxu1 %vm1366_vm0, %v1365_v0  ;;  %v1143_v6 = vld [vmem:[#allocation7 + $0x30] sm:$0xff]   ;;  %v1138_v7 = vld [vmem:[#allocation5 + $0x18] sm:$0xff]   ;;  %v1144_v8 = vld [vmem:[#allocation7 + $0x28] sm:$0xff]  }
  0x56   :  { %1003 = vmatpush3.bf16.msra.mxu0 %v1134_v1  ;;  %1023 = vmatpush3.bf16.msra.mxu1 %v1142_v4  ;;  %v1139_v9 = vld [vmem:[#allocation5 + $0x10] sm:$0xff]   ;;  %v1145_v10 = vld [vmem:[#allocation7 + $0x20] sm:$0xff]   ;;  %v1140_v11 = vld [vmem:[#allocation5 + $0x8] sm:$0xff]  }
  0x57   :  { %1004 = vmatprep.subr.bf16.mxu0 %v1365_v0  ;;  %1024 = vmatprep.subr.bf16.mxu1 %v1365_v0  ;;  %v1146_v12 = vld [vmem:[#allocation7 + $0x18] sm:$0xff]   ;;  %v1141_v13 = vld [vmem:[#allocation5] sm:$0xff]   ;;  %v1147_v15 = vld [vmem:[#allocation7 + $0x10] sm:$0xff]  }
  0x58   :  { %v143_v14 = vld [vmem:[#allocation2] sm:$0xff]  ;;  %v1148_v17 = vld [vmem:[#allocation7 + $0x8] sm:$0xff]   ;;  %v1149_v18 = vld [vmem:[#allocation7] sm:$0xff]  }
  0x59   :  { %v144_v16 = vpack.c.bf16 %v143_v14, %v143_v14  ;;  %v1150_v19 = vld [vmem:[#allocation8 + $0x38] sm:$0xff]   ;;  %v1151_v20 = vld [vmem:[#allocation8 + $0x30] sm:$0xff]   ;;  %v1152_v21 = vld [vmem:[#allocation8 + $0x28] sm:$0xff]  }
  0x5a   :  { %1005 = vmatpush3.bf16.msra.mxu0 %v1135_v2  ;;  %1025 = vmatpush3.bf16.msra.mxu1 %v1143_v6  ;;  %v1153_v22 = vld [vmem:[#allocation8 + $0x20] sm:$0xff]   ;;  %v1154_v23 = vld [vmem:[#allocation8 + $0x18] sm:$0xff]   ;;  %v1155_v24 = vld [vmem:[#allocation8 + $0x10] sm:$0xff]  }
  0x5b   :  { %1006 = vmatprep.subr.bf16.mxu0 %v1365_v0  ;;  %1026 = vmatprep.subr.bf16.mxu1 %v1365_v0  ;;  %v892_v25 = vld [vmem:[%s1569_s3] ss:$0 sm:$0xff]  ;;  %v1156_v35 = vld [vmem:[#allocation8 + $0x8] sm:$0xff]   ;;  %v1157_v36 = vld [vmem:[#allocation8] sm:$0xff]  }
  0x5c   :  { %v901_v26 = vld [vmem:[%s1567_s1] ss:$0 sm:$0xff]  ;;  %v1159_v38 = vld [vmem:[#allocation10 + $0x30] sm:$0xff]   ;;  %v1160_v39 = vld [vmem:[#allocation10 + $0x28] sm:$0xff]  }
  0x5d   :  { %v1158_v37 = vld [vmem:[#allocation10 + $0x38] sm:$0xff]   ;;  %v1161_v40 = vld [vmem:[#allocation10 + $0x20] sm:$0xff]   ;;  %v1163_v42 = vld [vmem:[#allocation10 + $0x10] sm:$0xff]  }
  0x5e   :  { %1007 = vmatpush3.bf16.msra.mxu0 %v1136_v3  ;;  %1027 = vmatpush3.bf16.msra.mxu1 %v1144_v8  ;;  %v1162_v41 = vld [vmem:[#allocation10 + $0x18] sm:$0xff]   ;;  %v1164_v43 = vld [vmem:[#allocation10 + $0x8] sm:$0xff]   ;;  %v1165_v53 = vld [vmem:[#allocation10] sm:$0xff]  }
  0x5f   :  { %1008 = vmatprep.subr.bf16.mxu0 %v1365_v0  ;;  %1028 = vmatprep.subr.bf16.mxu1 %v1365_v0  ;;  %v902_v44 = vld [vmem:[%s1571_s5] ss:$0 sm:$0xff]  ;;  %v1167_v55 = vld [vmem:[#allocation11 + $0x30] sm:$0xff]   ;;  %v1168_v56 = vld [vmem:[#allocation11 + $0x28] sm:$0xff]  }
  0x60   :  { %v1166_v54 = vld [vmem:[#allocation11 + $0x38] sm:$0xff]   ;;  %v1169_v57 = vld [vmem:[#allocation11 + $0x20] sm:$0xff]   ;;  %v1171_v59 = vld [vmem:[#allocation11 + $0x10] sm:$0xff]  }
  0x61   :  { %v1170_v58 = vld [vmem:[#allocation11 + $0x18] sm:$0xff]   ;;  %v1172_v4 = vld [vmem:[#allocation11 + $0x8] sm:$0xff]  }
  0x62   :  { %1009 = vmatpush3.bf16.msra.mxu0 %v1137_v5  ;;  %1029 = vmatpush3.bf16.msra.mxu1 %v1145_v10  ;;  %v911_v60 = vld [vmem:[%s1573_s7] ss:$0 sm:$0xff]  ;;  %v1173_v5 = vld [vmem:[#allocation11] sm:$0xff]   ;;  %v1176_v8 = vld [vmem:[#allocation13 + $0x28] sm:$0xff]  }
  0x63   :  { %1010 = vmatprep.subr.bf16.mxu0 %v1365_v0  ;;  %1030 = vmatprep.subr.bf16.mxu1 %v1365_v0  ;;  %v1174_v6 = vld [vmem:[#allocation13 + $0x38] sm:$0xff]  }
  0x64   :  { %v1178_v10 = vld [vmem:[#allocation13 + $0x18] sm:$0xff]  }
  0x66   :  { %1011 = vmatpush3.bf16.msra.mxu0 %v1138_v7  ;;  %1031 = vmatpush3.bf16.msra.mxu1 %v1146_v12  ;;  %v1175_v7 = vld [vmem:[#allocation13 + $0x30] sm:$0xff]   ;;  %v920_v12 = vld [vmem:[%s1575_s9] ss:$0 sm:$0xff] }
  0x67   :  { %1012 = vmatprep.subr.bf16.mxu0 %v1365_v0  ;;  %1032 = vmatprep.subr.bf16.mxu1 %v1365_v0 }
  0x6a   :  { %1013 = vmatpush3.bf16.msra.mxu0 %v1139_v9  ;;  %1033 = vmatpush3.bf16.msra.mxu1 %v1147_v15  ;;  %v1177_v9 = vld [vmem:[#allocation13 + $0x20] sm:$0xff]  }
  0x6b   :  { %1014 = vmatprep.subr.bf16.mxu0 %v1365_v0  ;;  %1034 = vmatprep.subr.bf16.mxu1 %v1365_v0 }
  0x6e   :  { %1015 = vmatpush3.bf16.msra.mxu0 %v1140_v11  ;;  %1035 = vmatpush3.bf16.msra.mxu1 %v1148_v17  ;;  %v1179_v11 = vld [vmem:[#allocation13 + $0x10] sm:$0xff]  }
  0x6f   :  { %1016 = vmatprep.subr.bf16.mxu0 %v1365_v0  ;;  %1036 = vmatprep.subr.bf16.mxu1 %v1365_v0 }
  0x72   :  { %1017 = vmatpush3.bf16.msra.mxu0 %v1141_v13  ;;  %1037 = vmatpush3.bf16.msra.mxu1 %v1149_v18 }
  0x73   :  { %1042 = vmatprep.subr.bf16.mxu0 %v1365_v0  ;;  %1062 = vmatprep.subr.bf16.mxu1 %v1365_v0 }
  0x75   :  { %1019 = vmatmul.mubr.bf16.vlgmr.msra.gmra.mxu0 %v144_v16 }
  0x76   :  { %1058 = vmatprep.mubr.msk.bf16.mxu0 %vm1366_vm0, %v1365_v0  ;;  %1043 = vmatpush3.bf16.msra.mxu0 %v1150_v19 }
  0x77   :  { %1044 = vmatprep.subr.bf16.mxu0 %v1365_v0 }
  0x7a   :  { %1045 = vmatpush3.bf16.msra.mxu0 %v1151_v20 }
  0x7b   :  { %1046 = vmatprep.subr.bf16.mxu0 %v1365_v0 }
  0x7e   :  { %1047 = vmatpush3.bf16.msra.mxu0 %v1152_v21  ;;  %v1180_v21 = vld [vmem:[#allocation13 + $0x8] sm:$0xff]  }
  0x7f   :  { %1048 = vmatprep.subr.bf16.mxu0 %v1365_v0 }
  0x82   :  { %1049 = vmatpush3.bf16.msra.mxu0 %v1153_v22  ;;  %v1181_v22 = vld [vmem:[#allocation13] sm:$0xff]  }
  0x83   :  { %1050 = vmatprep.subr.bf16.mxu0 %v1365_v0 }
  0x86   :  { %1051 = vmatpush3.bf16.msra.mxu0 %v1154_v23  ;;  %v929_v23 = vld [vmem:[%s1577_s11] ss:$0 sm:$0xff]  ;;  %s1367_s11 = smov [#allocation14]  }
  0x87   :  { %1052 = vmatprep.subr.bf16.mxu0 %v1365_v0  ;;  %s880_s20 = sshll.u32 %s1367_s11, 4  ;;  %s881_s20 = int_to_ptr.vmem [resolvable:$true] %s880_s20 }
  0x88   :  { %s1326_s21 = scalar_lea.vmem %s881_s20, 16  ;;  %p1331_p8 = scmp.lt.s32.totalorder %s881_s20, %s881_s20 }
  0x89   :  { %p1327_p7 = scmp.ne.s32.totalorder %s881_s20, %s1326_s21 }
  0x8a   :  { %1053 = vmatpush3.bf16.msra.mxu0 %v1155_v24 }
  0x8b   :  { %1054 = vmatprep.subr.bf16.mxu0 %v1365_v0 }
  0x8e   :  { %1055 = vmatpush3.bf16.msra.mxu0 %v1156_v35 }
  0x8f   :  { %1056 = vmatprep.subr.bf16.mxu0 %v1365_v0 }
  0x92   :  { %1057 = vmatpush3.bf16.msra.mxu0 %v1157_v36 }
  0x93   :  { %1082 = vmatprep.subr.bf16.mxu0 %v1365_v0 }
 0x135   :  { %v250_v27 = vpop.f32.mrf.mxu0 }
 0x136   :  { %v251_v28 = vadd.f32 %v892_v25, %v250_v27 }
 0x137   :  { %v1020_v29 = vpop.f32.mrf.mxu0 }
 0x138   :  { %vm256_vm1 = vcmp.gt.f32.partialorder %v251_v28, 0.0  ;;  %v263_v30 = vmul.f32 %v901_v26, %v251_v28 }
 0x139   :  { %v253_v31 = vpop.f32.mrf.mxu0 }
 0x13a   :  { %v264_v32 = vsel %vm256_vm1, %v251_v28, %v263_v30 }
 0x13b   :  { %v1021_v33 = vpop.f32.mrf.mxu0  ;;  %v265_v34 = vpack.c.bf16 %v264_v32, %v264_v32 }
 0x13d   :  { %1039 = vmatmul.mubr.bf16.vlgmr.msra.gmra.mxu1 %v265_v34 }
 0x13e   :  { %1078 = vmatprep.mubr.msk.bf16.mxu1 %vm1366_vm0, %v1365_v0  ;;  %1063 = vmatpush3.bf16.msra.mxu1 %v1158_v37 }
 0x13f   :  { %1064 = vmatprep.subr.bf16.mxu1 %v1365_v0 }
 0x142   :  { %1065 = vmatpush3.bf16.msra.mxu1 %v1159_v38 }
 0x143   :  { %1066 = vmatprep.subr.bf16.mxu1 %v1365_v0 }
 0x146   :  { %1067 = vmatpush3.bf16.msra.mxu1 %v1160_v39 }
 0x147   :  { %1068 = vmatprep.subr.bf16.mxu1 %v1365_v0 }
 0x14a   :  { %1069 = vmatpush3.bf16.msra.mxu1 %v1161_v40 }
 0x14b   :  { %1070 = vmatprep.subr.bf16.mxu1 %v1365_v0 }
 0x14e   :  { %1071 = vmatpush3.bf16.msra.mxu1 %v1162_v41 }
 0x14f   :  { %1072 = vmatprep.subr.bf16.mxu1 %v1365_v0 }
 0x152   :  { %1073 = vmatpush3.bf16.msra.mxu1 %v1163_v42 }
 0x153   :  { %1074 = vmatprep.subr.bf16.mxu1 %v1365_v0 }
 0x156   :  { %1075 = vmatpush3.bf16.msra.mxu1 %v1164_v43 }
 0x157   :  { %1076 = vmatprep.subr.bf16.mxu1 %v1365_v0 }
 0x15a   :  { %1077 = vmatpush3.bf16.msra.mxu1 %v1165_v53 }
 0x15b   :  { %1102 = vmatprep.subr.bf16.mxu1 %v1365_v0 }
 0x1fd   :  { %v371_v45 = vpop.f32.mrf.mxu1 }
 0x1fe   :  { %v372_v46 = vadd.f32 %v902_v44, %v371_v45 }
 0x1ff   :  { %v1040_v47 = vpop.f32.mrf.mxu1 }
 0x200   :  { %vm377_vm2 = vcmp.gt.f32.partialorder %v372_v46, 0.0  ;;  %v378_v48 = vmul.f32 %v901_v26, %v372_v46 }
 0x201   :  { %v374_v49 = vpop.f32.mrf.mxu1 }
 0x202   :  { %v379_v50 = vsel %vm377_vm2, %v372_v46, %v378_v48 }
 0x203   :  { %v380_v51 = vpack.c.bf16 %v379_v50, %v379_v50  ;;  %v1041_v52 = vpop.f32.mrf.mxu1 }
 0x205   :  { %1059 = vmatmul.mubr.bf16.vlgmr.msra.gmra.mxu0 %v380_v51 }
 0x206   :  { %1098 = vmatprep.mubr.msk.bf16.mxu0 %vm1366_vm0, %v1365_v0  ;;  %1083 = vmatpush3.bf16.msra.mxu0 %v1166_v54 }
 0x207   :  { %1084 = vmatprep.subr.bf16.mxu0 %v1365_v0 }
 0x20a   :  { %1085 = vmatpush3.bf16.msra.mxu0 %v1167_v55 }
 0x20b   :  { %1086 = vmatprep.subr.bf16.mxu0 %v1365_v0 }
 0x20e   :  { %1087 = vmatpush3.bf16.msra.mxu0 %v1168_v56 }
 0x20f   :  { %1088 = vmatprep.subr.bf16.mxu0 %v1365_v0 }
 0x212   :  { %1089 = vmatpush3.bf16.msra.mxu0 %v1169_v57 }
 0x213   :  { %1090 = vmatprep.subr.bf16.mxu0 %v1365_v0 }
 0x216   :  { %1091 = vmatpush3.bf16.msra.mxu0 %v1170_v58 }
 0x217   :  { %1092 = vmatprep.subr.bf16.mxu0 %v1365_v0 }
 0x21a   :  { %1093 = vmatpush3.bf16.msra.mxu0 %v1171_v59 }
 0x21b   :  { %1094 = vmatprep.subr.bf16.mxu0 %v1365_v0 }
 0x21e   :  { %1095 = vmatpush3.bf16.msra.mxu0 %v1172_v4 }
 0x21f   :  { %1096 = vmatprep.subr.bf16.mxu0 %v1365_v0 }
 0x222   :  { %1097 = vmatpush3.bf16.msra.mxu0 %v1173_v5 }
 0x2c5   :  { %v486_v61 = vpop.f32.mrf.mxu0 }
 0x2c6   :  { %v487_v62 = vadd.f32 %v911_v60, %v486_v61 }
 0x2c7   :  { %v1060_v63 = vpop.f32.mrf.mxu0 }
 0x2c8   :  { %v492_v1 = vpack.c.bf16 %v487_v62, %v487_v62 }
 0x2c9   :  { %v489_v2 = vpop.f32.mrf.mxu0 }
 0x2ca   :  { %1079 = vmatmul.mubr.bf16.vlgmr.msra.gmra.mxu1 %v492_v1 }
 0x2cb   :  { %v1061_v3 = vpop.f32.mrf.mxu0  ;;  %1118 = vmatprep.mubr.msk.bf16.mxu1 %vm1366_vm0, %v1365_v0  ;;  %1103 = vmatpush3.bf16.msra.mxu1 %v1174_v6 }
 0x2cc   :  { %1104 = vmatprep.subr.bf16.mxu1 %v1365_v0 }
 0x2cf   :  { %1105 = vmatpush3.bf16.msra.mxu1 %v1175_v7 }
 0x2d0   :  { %1106 = vmatprep.subr.bf16.mxu1 %v1365_v0 }
 0x2d3   :  { %1107 = vmatpush3.bf16.msra.mxu1 %v1176_v8 }
 0x2d4   :  { %1108 = vmatprep.subr.bf16.mxu1 %v1365_v0 }
 0x2d7   :  { %1109 = vmatpush3.bf16.msra.mxu1 %v1177_v9 }
 0x2d8   :  { %1110 = vmatprep.subr.bf16.mxu1 %v1365_v0 }
 0x2db   :  { %1111 = vmatpush3.bf16.msra.mxu1 %v1178_v10 }
 0x2dc   :  { %1112 = vmatprep.subr.bf16.mxu1 %v1365_v0 }
 0x2df   :  { %1113 = vmatpush3.bf16.msra.mxu1 %v1179_v11 }
 0x2e0   :  { %1114 = vmatprep.subr.bf16.mxu1 %v1365_v0 }
 0x2e3   :  { %1115 = vmatpush3.bf16.msra.mxu1 %v1180_v21 }
 0x2e4   :  { %1116 = vmatprep.subr.bf16.mxu1 %v1365_v0  ;;  %v938_v0 = vld [vmem:[%s1579_s13] ss:$0 sm:$0xff]  ;;  %s1330_s13 = scalar_lea.vmem %s881_s20, 32 }
 0x2e5   :  { %p1332_p9 = scmp.lt.s32.totalorder %s1330_s13, %s1326_s21 }
 0x2e7   :  { %1117 = vmatpush3.bf16.msra.mxu1 %v1181_v22  ;;  %p1333_p10 = por %p1332_p9, %p1331_p8 }
 0x2e9   :  { %p1334_p11 = pnand %p1333_p10, %p1327_p7 }
 0x38a   :  { %v598_v13 = vpop.f32.mrf.mxu1 }
 0x38b   :  { %v599_v14 = vadd.f32 %v920_v12, %v598_v13 }
 0x38c   :  { %v1080_v15 = vpop.f32.mrf.mxu1 }
 0x38d   :  { %vm604_vm3 = vcmp.gt.f32.partialorder %v599_v14, 0.0  ;;  %v605_v16 = vmul.f32 0.2, %v599_v14 }
 0x38e   :  { %v601_v17 = vpop.f32.mrf.mxu1 }
 0x38f   :  { %v606_v18 = vsel %vm604_vm3, %v599_v14, %v605_v16 }
 0x390   :  { %v607_v19 = vpack.c.bf16 %v606_v18, %v606_v18  ;;  %v1081_v20 = vpop.f32.mrf.mxu1 }
 0x392   :  { %1099 = vmatmul.mubr.bf16.vlgmr.msra.gmra.mxu0 %v607_v19 }
 0x452   :  { %v713_v24 = vpop.f32.mrf.mxu0 }
 0x453   :  { %v714_v25 = vadd.f32 %v929_v23, %v713_v24 }
 0x454   :  { %v1100_v26 = vpop.f32.mrf.mxu0 }
 0x455   :  { %vm719_vm4 = vcmp.gt.f32.partialorder %v714_v25, 0.0  ;;  %v720_v27 = vmul.f32 0.2, %v714_v25 }
 0x456   :  { %v716_v28 = vpop.f32.mrf.mxu0 }
 0x457   :  { %v721_v29 = vsel %vm719_vm4, %v714_v25, %v720_v27 }
 0x458   :  { %v722_v30 = vpack.c.bf16 %v721_v29, %v721_v29  ;;  %v1101_v31 = vpop.f32.mrf.mxu0 }
 0x45a   :  { %1119 = vmatmul.mubr.bf16.vlgmr.msra.gmra.mxu1 %v722_v30 }
 0x51a   :  { %v828_v32 = vpop.f32.mrf.mxu1 }
 0x51b   :  { %v829_v33 = vadd.f32 %v938_v0, %v828_v32 }
 0x51c   :  { %v1120_v34 = vpop.f32.mrf.mxu1 }
 0x51d   :  { %834 = vxpose.xlu0.b32.start.end [1/1] (short) (narrow) %v829_v33, 8 }
 0x51e   :  { %v831_v35 = vpop.f32.mrf.mxu1 }
 0x520   :  { %v1121_v36 = vpop.f32.mrf.mxu1 }
 0x599   :  { %v850_v37 = vpop.trf.xlu0 }
 0x59a   :  { %v947_v38 = vmul.f32 -1.442695, %v850_v37 }
 0x59c   :  { %1182 = vpow2.f32 %v947_v38 }
 0x5a9   :  { %v1183_v39 = vpop.eup %1182 }
 0x5aa   :  { %v869_v40 = vadd.f32 1.0, %v1183_v39 }
 0x5ac   :  { %1184 = vrcp.f32 %v869_v40 }
 0x5b9   :  { %v1185_v41 = vpop.eup %1184 }
 0x5ba   :  { %873 = vst.msk [vmem:[#allocation14] sm:$0x1] %vm872_vm5, %v1185_v41 }
 0x5bb   :  { %1337 = shalt.err (!%p1334_p11)
}
 0x5bc   :  { %883 = dma.vmem_to_hbm [thread:$0]  %s881_s20, 16, %s1580_s14, [#allocation4]  }
 0x5bd   :  { %1354 = dma.done.wait [#allocation4], 16  }
 0x5be   :  { %1355 = vsyncadd [#allocation4], 4294967280 }
 0x5bf   :  { %887 = vsyncpa [#allocation3], 1 }
 0x5c0   :  { %888 = vsyncpa [#allocation6], 1 }
 0x5c1   :  { %889 = vsyncpa [#allocation9], 1 }
 0x5c2   :  { %890 = vsyncpa [#allocation12], 1 }
 0x5c3   :  { %891 = vsyncpa [#allocation4], 1 }

</bundles_post_ra>
